<compile_context>
chip_gen: v7x
topology: tpu7x:2x2x1
jax: 0.10.0
libtpu: 0.0.40
codegen_flags: <defaults>
</compile_context>

<pallas_src>
import jax
import jax.numpy as jnp
from jax.experimental import pallas as pl
from jax.experimental.pallas import tpu as pltpu

EPS = 1e-8  # matches torch.nn.functional.cosine_similarity default eps


def _round_up(x, m):
    return ((x + m - 1) // m) * m


def attn_wordavg_kernel(emb_ref, u_ref, acc_ref):
    """emb_ref: (TB, TS, E) streamed embeddings (pad tokens pre-zeroed).
    u_ref:   (1, E) pre-normalized attention vector u / max(||u||, eps).
    acc_ref: (TB, E) f32 output block, resident across the seq grid axis."""
    s = pl.program_id(1)

    @pl.when(s == 0)
    def _():
        acc_ref[...] = jnp.zeros_like(acc_ref)

    x = emb_ref[...].astype(jnp.float32)                 # (TB, TS, E)
    u_hat = u_ref[...].reshape(1, 1, -1)                 # (1, 1, E)

    dot = jnp.sum(x * u_hat, axis=-1, keepdims=True)     # (TB, TS, 1) = x . u/||u||
    sumsq = jnp.sum(x * x, axis=-1, keepdims=True)       # (TB, TS, 1)
    # 1 / max(||x||, eps) == min(rsqrt(sum x^2), 1/eps)   (rsqrt -> EUP slot)
    inv_xnorm = jnp.minimum(jax.lax.rsqrt(sumsq), 1.0 / EPS)
    alpha = jnp.exp(dot * inv_xnorm)                      # (TB, TS, 1)

    # Padded token rows are already zero, so they contribute nothing here.
    acc_ref[...] += jnp.sum(alpha * x, axis=1)            # (TB, E)


def based_attention_word_avg(text, embed_table, u, w_t, bias, *,
                             stream_dtype=jnp.bfloat16):
    """text: (S, B) int32; embed_table: (V, E); u: (E,); w_t: (E, O); bias: (O,)."""
    S, B = text.shape
    E = embed_table.shape[1]
    elem = jnp.dtype(stream_dtype).itemsize

    # --- generation-aware VMEM budget ---------------------------------------
    try:
        vmem_cap = int(getattr(pltpu.get_tpu_info(), "vmem_capacity_bytes", 64 << 20))
    except Exception:
        vmem_cap = 64 << 20                       # v7x-safe fallback (64 MiB / TC)
    vmem_ceiling = (vmem_cap * 3) // 4            # leave 1/4 headroom for compiler

    # --- tile selection -------------------------------------------------------
    # Batch tile: multiple of 8; ensure >=2 tiles on the "parallel" axis when the
    # batch is big enough so both v7x TensorCores get work.
    tb = min(64, _round_up(B, 8))
    if B > 8 and _round_up(B, tb) // tb < 2:
        tb = _round_up(pl.cdiv(B, 2), 8)
    b_pad = _round_up(B, tb)

    # Seq tile: multiple of 16 (bf16 sublane packing).  Budget per element =
    # double-buffered stream (2*elem) + ~5 full-size f32 temporaries (20 B).
    per_row_bytes = tb * E * (2 * elem + 5 * 4)
    block_budget = max(8 << 20, min(vmem_ceiling // 2, 48 << 20))
    ts = block_budget // max(per_row_bytes, 1)
    ts = max(16, (ts // 16) * 16)
    ts = min(ts, 1024, _round_up(S, 16))
    s_pad = _round_up(S, ts)

    # --- data prep: batch-major bf16 stream, pad-mask folded in ---------------
    # Padding uses token id 0, which is this module's pad id (mask = text != 0).
    text_bs = jnp.transpose(text, (1, 0)).astype(jnp.int32)          # (B, S)
    text_bs = jnp.pad(text_bs, ((0, b_pad - B), (0, s_pad - S)))     # pad id 0
    emb = jnp.take(embed_table.astype(stream_dtype), text_bs, axis=0)  # (b_pad, s_pad, E)
    emb = jnp.where((text_bs != 0)[:, :, None], emb, 0).astype(stream_dtype)

    # Hoist the loop-invariant u normalization (PyTorch eps: clamp ||u|| alone).
    u_f32 = u.astype(jnp.float32)
    u_hat = (u_f32 / jnp.maximum(jnp.linalg.norm(u_f32), EPS)).reshape(1, E)

    emb_block_bytes = tb * ts * E * elem
    f32_block_bytes = tb * ts * E * 4
    need = 2 * emb_block_bytes + 5 * f32_block_bytes + 2 * tb * E * 4 + (2 << 20)
    vmem_limit = int(min(max(need, 8 << 20), vmem_ceiling))

    acc = pl.pallas_call(
        attn_wordavg_kernel,
        out_shape=jax.ShapeDtypeStruct((b_pad, E), jnp.float32),
        grid_spec=pltpu.PrefetchScalarGridSpec(
            num_scalar_prefetch=0,
            grid=(b_pad // tb, s_pad // ts),            # (batch tiles, seq tiles)
            in_specs=[
                pl.BlockSpec((tb, ts, E), lambda b, s: (b, s, 0)),   # embeddings
                pl.BlockSpec((1, E), lambda b, s: (0, 0)),           # u / ||u||
            ],
            out_specs=pl.BlockSpec((tb, E), lambda b, s: (b, 0)),
        ),
        compiler_params=pltpu.CompilerParams(
            dimension_semantics=("parallel", "arbitrary"),
            allow_input_fusion=[True, False],
            vmem_limit_bytes=vmem_limit,
        ),
    )(emb, u_hat)

    # Tiny (B, E) @ (E, O) + b stays in XLA: keeps the kernel's output store
    # lane-dense on E and removes two resident weight inputs from VMEM.
    return acc[:B] @ w_t.astype(jnp.float32) + bias.astype(jnp.float32)


def reference_forward(text, embed_table, u, w_t, bias, stream_dtype=jnp.float32):
    """Pure-JAX reference mirroring the PyTorch forward (dropout = identity).

    `stream_dtype` applies the same rounding the kernel uses when streaming
    embeddings, so each path is compared against matching-precision math.
    """
    emb = jnp.take(embed_table, text, axis=0).astype(stream_dtype).astype(jnp.float32)
    S, B, E = emb.shape
    flat = emb.reshape(-1, E)
    x_norm = jnp.maximum(jnp.sqrt(jnp.sum(flat * flat, axis=1)), EPS)
    u_norm = jnp.maximum(jnp.sqrt(jnp.sum(u * u)), EPS)
    dots = jnp.sum(flat * u[None, :], axis=1)
    alpha = jnp.exp(dots / (x_norm * u_norm)).reshape(S, B)
    h_t = alpha[..., None] * emb
    mask = (text != 0).astype(jnp.float32)[..., None]
    masked = (h_t * mask).sum(0)                                   # (B, E)
    return masked @ w_t + bias


if __name__ == "__main__":
    # Small, forward-consistent shapes
    vocab_size = 50
    embed_size = 32
    output_size = 4
    seq_len = 8
    batch = 2
    initrange = 0.1

    key = jax.random.PRNGKey(0)
    k_emb, k_u, k_w, k_txt = jax.random.split(key, 4)

    # Deterministic parameter init mirroring init_weight():
    #   embed.weight ~ U(-initrange, initrange), linear.weight ~ U(-initrange, initrange),
    #   linear.bias = 0, u ~ U(0, 1) (torch.rand)
    embed_table = jax.random.uniform(
        k_emb, (vocab_size, embed_size), minval=-initrange, maxval=initrange,
        dtype=jnp.float32)
    u = jax.random.uniform(k_u, (embed_size,), dtype=jnp.float32)
    w_pt = jax.random.uniform(
        k_w, (output_size, embed_size), minval=-initrange, maxval=initrange,
        dtype=jnp.float32)          # PyTorch nn.Linear weight layout (O, E)
    w_t = w_pt.T                    # kernel consumes (E, O)
    bias = jnp.zeros((output_size,), dtype=jnp.float32)

    # Token ids in [0, vocab); id 0 acts as padding (mask = text != 0)
    text = jax.random.randint(k_txt, (seq_len, batch), 0, vocab_size, dtype=jnp.int32)

    # Default bf16-streaming path (HBM-bandwidth optimized); compared against a
    # reference using the same bf16-rounded embeddings but f32 math.
    out = jax.block_until_ready(
        based_attention_word_avg(text, embed_table, u, w_t, bias))
    ref = reference_forward(text, embed_table, u, w_t, bias,
                            stream_dtype=jnp.bfloat16)
    assert out.shape == (batch, output_size)
    assert jnp.allclose(out, ref, atol=5e-5, rtol=1e-4), (out, ref)

    # f32-streaming path: matches the pure-f32 PyTorch math to tight tolerance.
    out_f32 = jax.block_until_ready(
        based_attention_word_avg(text, embed_table, u, w_t, bias,
                                 stream_dtype=jnp.float32))
    ref_f32 = reference_forward(text, embed_table, u, w_t, bias,
                                stream_dtype=jnp.float32)
    assert jnp.allclose(out_f32, ref_f32, atol=1e-5, rtol=1e-5), (out_f32, ref_f32)

    print("KERNEL_OK")
</pallas_src>

<mosaic_0001>
module attributes {stable_mosaic.version = 11 : i64} {
  func.func @attn_wordavg_kernel(%arg0: i32, %arg1: i32, %arg2: memref<8x16x32xbf16, #tpu.memory_space<vmem>>, %arg3: memref<1x32xf32, #tpu.memory_space<vmem>>, %arg4: memref<8x32xf32, #tpu.memory_space<vmem>>) attributes {dimension_semantics = [#tpu.dimension_semantics<parallel>, #tpu.dimension_semantics<arbitrary>], iteration_bounds = array<i64: 1, 1>, scalar_prefetch = 0 : i64, scratch_operands = 0 : i64, tpu.core_type = #tpu.core_type<tc>, window_params = [{transform_indices = @transform_0, window_bounds = array<i64: 8, 16, 32>}, {pipeline_mode = #tpu.pipeline_mode<synchronous>, transform_indices = @transform_1, window_bounds = array<i64: 1, 32>}, {transform_indices = @transform_2, window_bounds = array<i64: 8, 32>}]} {
    %c0_i32 = arith.constant 0 : i32
    %0 = arith.cmpi eq, %arg1, %c0_i32 : i32
    %1 = arith.extui %0 : i1 to i32
    %c0_i32_0 = arith.constant 0 : i32
    %2 = arith.cmpi ne, %1, %c0_i32_0 : i32
    scf.if %2 {
      %cst_12 = arith.constant 0.000000e+00 : f32
      %25 = vector.broadcast %cst_12 : f32 to vector<8x32xf32>
      %c0_13 = arith.constant 0 : index
      %c0_14 = arith.constant 0 : index
      %26 = vector.load %arg4[%c0_13, %c0_14] : memref<8x32xf32, #tpu.memory_space<vmem>>, vector<8x32xf32>
      tpu.vector_store %arg4[%c0_13, %c0_14], %25 {strides = array<i32>} : memref<8x32xf32, #tpu.memory_space<vmem>>, vector<8x32xf32>,
    } else {
    }
    %c0 = arith.constant 0 : index
    %c0_1 = arith.constant 0 : index
    %c0_2 = arith.constant 0 : index
    %3 = vector.load %arg2[%c0, %c0_1, %c0_2] : memref<8x16x32xbf16, #tpu.memory_space<vmem>>, vector<8x16x32xbf16>
    %4 = arith.extf %3 : vector<8x16x32xbf16> to vector<8x16x32xf32>
    %c0_3 = arith.constant 0 : index
    %c0_4 = arith.constant 0 : index
    %5 = vector.load %arg3[%c0_3, %c0_4] : memref<1x32xf32, #tpu.memory_space<vmem>>, vector<1x32xf32>
    %6 = vector.shape_cast %5 : vector<1x32xf32> to vector<1x1x32xf32>
    %7 = vector.broadcast %6 : vector<1x1x32xf32> to vector<8x16x32xf32>
    %8 = arith.mulf %4, %7 : vector<8x16x32xf32>
    %cst = arith.constant dense<0.000000e+00> : vector<8x16xf32>
    %9 = vector.multi_reduction <add>, %8, %cst [2] : vector<8x16x32xf32> to vector<8x16xf32>
    %10 = vector.shape_cast %9 : vector<8x16xf32> to vector<8x16x1xf32>
    %11 = arith.mulf %4, %4 : vector<8x16x32xf32>
    %cst_5 = arith.constant dense<0.000000e+00> : vector<8x16xf32>
    %12 = vector.multi_reduction <add>, %11, %cst_5 [2] : vector<8x16x32xf32> to vector<8x16xf32>
    %13 = vector.shape_cast %12 : vector<8x16xf32> to vector<8x16x1xf32>
    %14 = math.rsqrt %13 : vector<8x16x1xf32>
    %cst_6 = arith.constant 1.000000e+08 : f32
    %15 = vector.broadcast %cst_6 : f32 to vector<8x16x1xf32>
    %16 = arith.minimumf %14, %15 : vector<8x16x1xf32>
    %17 = arith.mulf %10, %16 : vector<8x16x1xf32>
    %18 = math.exp %17 : vector<8x16x1xf32>
    %c0_7 = arith.constant 0 : index
    %c0_8 = arith.constant 0 : index
    %19 = vector.load %arg4[%c0_7, %c0_8] : memref<8x32xf32, #tpu.memory_space<vmem>>, vector<8x32xf32>
    %20 = vector.broadcast %18 : vector<8x16x1xf32> to vector<8x16x32xf32>
    %21 = arith.mulf %20, %4 : vector<8x16x32xf32>
    %cst_9 = arith.constant dense<0.000000e+00> : vector<8x32xf32>
    %22 = vector.multi_reduction <add>, %21, %cst_9 [1] : vector<8x16x32xf32> to vector<8x32xf32>
    %23 = arith.addf %19, %22 : vector<8x32xf32>
    %c0_10 = arith.constant 0 : index
    %c0_11 = arith.constant 0 : index
    %24 = vector.load %arg4[%c0_10, %c0_11] : memref<8x32xf32, #tpu.memory_space<vmem>>, vector<8x32xf32>
    tpu.vector_store %arg4[%c0_10, %c0_11], %23 {strides = array<i32>} : memref<8x32xf32, #tpu.memory_space<vmem>>, vector<8x32xf32>,
    return
  }
  func.func @transform_0(%arg0: i32, %arg1: i32) -> (i32, i32, i32) {
    %c0_i32 = arith.constant 0 : i32
    %c0_i32_0 = arith.constant 0 : i32
    return %arg0, %arg1, %c0_i32 : i32, i32, i32
  }
  func.func @transform_1(%arg0: i32, %arg1: i32) -> (i32, i32) {
    %c0_i32 = arith.constant 0 : i32
    %c0_i32_0 = arith.constant 0 : i32
    %c0_i32_1 = arith.constant 0 : i32
    return %c0_i32, %c0_i32_0 : i32, i32
  }
  func.func @transform_2(%arg0: i32, %arg1: i32) -> (i32, i32) {
    %c0_i32 = arith.constant 0 : i32
    %c0_i32_0 = arith.constant 0 : i32
    return %arg0, %c0_i32 : i32, i32
  }
}

</mosaic_0001>

<bundles_post_ra>
// kernel: tpu_custom_call.1
= control target key start
LH: loop header
LB: loop body
LE: loop exit
PB: predicated region body
PF: predicated region fallthrough
CT: control target
= control target key end

     0   :  { %7 = vsyncpa [#allocation3], 0  ;;  %s759_s0 = inlined_call_operand.hbm [shape: bf16[8,16,32], index: 0, kind: input, shape index: {}]   ;;  %s760_s1 = inlined_call_operand.vmem [shape: f32[1,32], index: 1, kind: input, shape index: {}]   ;;  %s761_s2 = inlined_call_operand.hbm [shape: f32[8,32], index: 2, kind: output, shape index: {}]  }
   0x1   :  { %8 = vsyncpa [#allocation4], 0  ;;  %s566_s9 = smov [#allocation2]   ;;  %s518_s13 = scalar_lea.hbm %s759_s0, 1024 }
   0x2   :  { %s14_s10 = sshll.u32 %s566_s9, 4  ;;  %p519_p0 = scmp.ne.s32.totalorder %s759_s0, %s518_s13  ;;  %s15_s10 = int_to_ptr.vmem [resolvable:$true] %s14_s10 }
   0x3   :  { %p522_p1 = scmp.lt.u32.totalorder %s518_s13, %s759_s0 }
   0x5   :  { %p524_p2 = pnand %p522_p1, %p519_p0 }
   0x7   :  { %527 = shalt.err (!%p524_p2)
}
   0x8   :  { %s528_s18 = scalar_lea.vmem %s15_s10, 1024  ;;  %p533_p4 = scmp.lt.s32.totalorder %s15_s10, %s15_s10 }
   0x9   :  { %p529_p3 = scmp.ne.s32.totalorder %s15_s10, %s528_s18  ;;  %p534_p5 = scmp.lt.s32.totalorder %s528_s18, %s528_s18 }
   0xb   :  { %p535_p6 = por %p534_p5, %p533_p4 }
   0xd   :  { %p536_p7 = pnand %p535_p6, %p529_p3 }
   0xf   :  { %539 = shalt.err (!%p536_p7)
}
  0x10   :  { %s567_s19 = smov 64   ;;  %s568_s20 = smov 4  }
  0x11   :  { %20 = dma.hbm_to_vmem [thread:$0]  %s759_s0, 1024, %s15_s10, [#allocation3], %s567_s19, %s567_s19, %s568_s20  }
  0x12   :  { %562 = dma.done.wait [#allocation3], 1024  }
  0x13   :  { %563 = vsyncadd [#allocation3], 4294966272  ;;  %v442_v0 = vld [vmem:[#allocation2 + $0x8] sm:$0xff]   ;;  %v411_v1 = vld [vmem:[#allocation2] sm:$0xff]   ;;  %vm30_vm0 = vcmask 261120   ;;  %vm377_vm1 = vcmask 1041409  }
  0x14   :  { %v443_v2 = vld [vmem:[#allocation2 + $0x10] sm:$0xff]   ;;  %v598_v3 = vunpack.c.l.bf16 %v442_v0  ;;  %v600_v4 = vunpack.c.l.bf16 %v411_v1  ;;  %v602_v5 = vunpack.c.h.bf16 %v442_v0  ;;  %v604_v6 = vunpack.c.h.bf16 %v411_v1  ;;  %v444_v13 = vld [vmem:[#allocation2 + $0x18] sm:$0xff]   ;;  %v445_v22 = vld [vmem:[#allocation2 + $0x20] sm:$0xff]  }
  0x15   :  { %v606_v7 = vunpack.c.h.bf16 %v443_v2  ;;  %v608_v8 = vunpack.c.l.bf16 %v443_v2  ;;  %v620_v16 = vunpack.c.h.bf16 %v444_v13  ;;  %v622_v17 = vunpack.c.l.bf16 %v444_v13  ;;  %v446_v29 = vld [vmem:[#allocation2 + $0x28] sm:$0xff]   ;;  %v447_v36 = vld [vmem:[#allocation2 + $0x30] sm:$0xff]   ;;  %v448_v43 = vld [vmem:[#allocation2 + $0x38] sm:$0xff]  }
  0x16   :  { %v138_v9 = vmul.f32 %v598_v3, %v598_v3  ;;  %v136_v10 = vmul.f32 %v600_v4, %v600_v4  ;;  %v139_v11 = vmul.f32 %v602_v5, %v602_v5  ;;  %v137_v12 = vmul.f32 %v604_v6, %v604_v6  ;;  %v409_v54 = vld [vmem:[%s760_s1] ss:$0 sm:$0xff]  ;;  %s570_s1 = smov [#allocation5]  }
  0x17   :  { %v141_v20 = vmul.f32 %v606_v7, %v606_v7  ;;  %v140_v21 = vmul.f32 %v608_v8, %v608_v8  ;;  %v143_v23 = vmul.f32 %v620_v16, %v620_v16  ;;  %v142_v24 = vmul.f32 %v622_v17, %v622_v17  ;;  %s400_s24 = sshll.u32 %s570_s1, 4  ;;  %s401_s24 = int_to_ptr.vmem [resolvable:$true] %s400_s24 }
  0x18   :  { %v158_v14 = vsel %vm30_vm0, %v138_v9, 0.0  ;;  %v152_v15 = vsel %vm30_vm0, %v136_v10, 0.0  ;;  %v161_v18 = vsel %vm30_vm0, %v139_v11, 0.0  ;;  %v155_v19 = vsel %vm30_vm0, %v137_v12, 0.0  ;;  %s540_s25 = scalar_lea.vmem %s401_s24, 128  ;;  %p545_p9 = scmp.lt.s32.totalorder %s401_s24, %s401_s24 }
  0x19   :  { %159 = vadd.xlane.f32.xlu1 %v158_v14  ;;  %153 = vadd.xlane.f32.xlu0 %v152_v15  ;;  %v167_v25 = vsel %vm30_vm0, %v141_v20, 0.0  ;;  %v164_v26 = vsel %vm30_vm0, %v140_v21, 0.0  ;;  %v636_v27 = vunpack.c.h.bf16 %v445_v22  ;;  %v638_v28 = vunpack.c.l.bf16 %v445_v22  ;;  %p541_p8 = scmp.ne.s32.totalorder %s401_s24, %s540_s25  ;;  %p546_p10 = scmp.lt.s32.totalorder %s540_s25, %s540_s25 }
  0x1a   :  { %v173_v30 = vsel %vm30_vm0, %v143_v23, 0.0  ;;  %v170_v31 = vsel %vm30_vm0, %v142_v24, 0.0  ;;  %v646_v34 = vunpack.c.h.bf16 %v446_v29  ;;  %v648_v35 = vunpack.c.l.bf16 %v446_v29 }
  0x1b   :  { %v145_v32 = vmul.f32 %v636_v27, %v636_v27  ;;  %v144_v33 = vmul.f32 %v638_v28, %v638_v28  ;;  %v650_v37 = vunpack.c.h.bf16 %v447_v36  ;;  %v652_v38 = vunpack.c.l.bf16 %v447_v36  ;;  %p547_p11 = por %p546_p10, %p545_p9 }
  0x1c   :  { %v147_v41 = vmul.f32 %v646_v34, %v646_v34  ;;  %v146_v42 = vmul.f32 %v648_v35, %v648_v35  ;;  %v660_v44 = vunpack.c.h.bf16 %v448_v43  ;;  %v662_v45 = vunpack.c.l.bf16 %v448_v43 }
  0x1d   :  { %162 = vadd.xlane.f32.xlu1 %v161_v18  ;;  %156 = vadd.xlane.f32.xlu0 %v155_v19  ;;  %v179_v39 = vsel %vm30_vm0, %v145_v32, 0.0  ;;  %v176_v40 = vsel %vm30_vm0, %v144_v33, 0.0  ;;  %v149_v48 = vmul.f32 %v650_v37, %v650_v37  ;;  %v148_v49 = vmul.f32 %v652_v38, %v652_v38  ;;  %p548_p12 = pnand %p547_p11, %p541_p8 }
  0x1e   :  { %v185_v46 = vsel %vm30_vm0, %v147_v41, 0.0  ;;  %v182_v47 = vsel %vm30_vm0, %v146_v42, 0.0  ;;  %v151_v52 = vmul.f32 %v660_v44, %v660_v44  ;;  %v150_v53 = vmul.f32 %v662_v45, %v662_v45 }
  0x1f   :  { %v191_v50 = vsel %vm30_vm0, %v149_v48, 0.0  ;;  %v188_v51 = vsel %vm30_vm0, %v148_v49, 0.0  ;;  %v72_v57 = vmul.f32 %v604_v6, %v409_v54  ;;  %v71_v58 = vmul.f32 %v600_v4, %v409_v54 }
  0x20   :  { %v197_v55 = vsel %vm30_vm0, %v151_v52, 0.0  ;;  %v194_v56 = vsel %vm30_vm0, %v150_v53, 0.0  ;;  %v74_v61 = vmul.f32 %v602_v5, %v409_v54  ;;  %v73_v62 = vmul.f32 %v598_v3, %v409_v54 }
  0x21   :  { %168 = vadd.xlane.f32.xlu1 %v167_v25  ;;  %165 = vadd.xlane.f32.xlu0 %v164_v26  ;;  %v91_v59 = vsel %vm30_vm0, %v72_v57, 0.0  ;;  %v88_v60 = vsel %vm30_vm0, %v71_v58, 0.0  ;;  %v76_v1 = vmul.f32 %v606_v7, %v409_v54  ;;  %v75_v2 = vmul.f32 %v608_v8, %v409_v54 }
  0x22   :  { %v97_v63 = vsel %vm30_vm0, %v74_v61, 0.0  ;;  %v94_v0 = vsel %vm30_vm0, %v73_v62, 0.0  ;;  %v78_v11 = vmul.f32 %v620_v16, %v409_v54  ;;  %v77_v12 = vmul.f32 %v622_v17, %v409_v54 }
  0x23   :  { %v103_v9 = vsel %vm30_vm0, %v76_v1, 0.0  ;;  %v100_v10 = vsel %vm30_vm0, %v75_v2, 0.0  ;;  %v80_v15 = vmul.f32 %v636_v27, %v409_v54  ;;  %v79_v18 = vmul.f32 %v638_v28, %v409_v54 }
  0x24   :  { %v109_v13 = vsel %vm30_vm0, %v78_v11, 0.0  ;;  %v106_v14 = vsel %vm30_vm0, %v77_v12, 0.0  ;;  %v82_v21 = vmul.f32 %v646_v34, %v409_v54  ;;  %v81_v22 = vmul.f32 %v648_v35, %v409_v54 }
  0x25   :  { %174 = vadd.xlane.f32.xlu1 %v173_v30  ;;  %171 = vadd.xlane.f32.xlu0 %v170_v31  ;;  %v115_v19 = vsel %vm30_vm0, %v80_v15, 0.0  ;;  %v112_v20 = vsel %vm30_vm0, %v79_v18, 0.0  ;;  %v84_v25 = vmul.f32 %v650_v37, %v409_v54  ;;  %v83_v26 = vmul.f32 %v652_v38, %v409_v54 }
  0x26   :  { %v121_v23 = vsel %vm30_vm0, %v82_v21, 0.0  ;;  %v118_v24 = vsel %vm30_vm0, %v81_v22, 0.0  ;;  %v86_v31 = vmul.f32 %v660_v44, %v409_v54  ;;  %v85_v32 = vmul.f32 %v662_v45, %v409_v54 }
  0x27   :  { %v127_v29 = vsel %vm30_vm0, %v84_v25, 0.0  ;;  %v124_v30 = vsel %vm30_vm0, %v83_v26, 0.0  ;;  %vm379_vm2 = vcmask 1042434   ;;  %vm381_vm3 = vcmask 1043459  }
  0x28   :  { %v133_v33 = vsel %vm30_vm0, %v86_v31, 0.0  ;;  %v130_v36 = vsel %vm30_vm0, %v85_v32, 0.0  ;;  %vm383_vm4 = vcmask 1044484   ;;  %vm385_vm5 = vcmask 1045509  }
  0x29   :  { %180 = vadd.xlane.f32.xlu1 %v179_v39  ;;  %177 = vadd.xlane.f32.xlu0 %v176_v40  ;;  %v569_v39 = vmov 0.0   ;;  %vm387_vm6 = vcmask 1046534   ;;  %vm389_vm7 = vcmask 1047559  }
  0x2a   :  { %31 = vst.msk [vmem:[#allocation5] sm:$0xff] %vm30_vm0, %v569_v39 }
  0x2d   :  { %186 = vadd.xlane.f32.xlu1 %v185_v46  ;;  %183 = vadd.xlane.f32.xlu0 %v182_v47 }
  0x31   :  { %192 = vadd.xlane.f32.xlu1 %v191_v50  ;;  %189 = vadd.xlane.f32.xlu0 %v188_v51 }
  0x35   :  { %198 = vadd.xlane.f32.xlu1 %v197_v55  ;;  %195 = vadd.xlane.f32.xlu0 %v194_v56 }
  0x39   :  { %92 = vadd.xlane.f32.xlu1 %v91_v59  ;;  %89 = vadd.xlane.f32.xlu0 %v88_v60 }
  0x3d   :  { %98 = vadd.xlane.f32.xlu1 %v97_v63  ;;  %95 = vadd.xlane.f32.xlu0 %v94_v0 }
  0x41   :  { %104 = vadd.xlane.f32.xlu1 %v103_v9  ;;  %101 = vadd.xlane.f32.xlu0 %v100_v10 }
  0x45   :  { %110 = vadd.xlane.f32.xlu1 %v109_v13  ;;  %107 = vadd.xlane.f32.xlu0 %v106_v14 }
  0x49   :  { %116 = vadd.xlane.f32.xlu1 %v115_v19  ;;  %113 = vadd.xlane.f32.xlu0 %v112_v20 }
  0x4d   :  { %122 = vadd.xlane.f32.xlu1 %v121_v23  ;;  %119 = vadd.xlane.f32.xlu0 %v118_v24 }
  0x51   :  { %128 = vadd.xlane.f32.xlu1 %v127_v29  ;;  %125 = vadd.xlane.f32.xlu0 %v124_v30 }
  0x55   :  { %134 = vadd.xlane.f32.xlu1 %v133_v33  ;;  %131 = vadd.xlane.f32.xlu0 %v130_v36 }
  0xa6   :  { %v160_v40 = vpop.xlane.xlu1 %159  ;;  %v154_v41 = vpop.xlane.xlu0 %153 }
  0xa7   :  { %454 = vrsqrt.f32 %v154_v41 }
  0xaa   :  { %v163_v42 = vpop.xlane.xlu1 %162  ;;  %v157_v43 = vpop.xlane.xlu0 %156 }
  0xab   :  { %456 = vrsqrt.f32 %v157_v43 }
  0xac   :  { %458 = vrsqrt.f32 %v160_v40 }
  0xad   :  { %460 = vrsqrt.f32 %v163_v42 }
  0xae   :  { %v169_v46 = vpop.xlane.xlu1 %168  ;;  %v166_v47 = vpop.xlane.xlu0 %165 }
  0xaf   :  { %462 = vrsqrt.f32 %v169_v46 }
  0xb0   :  { %464 = vrsqrt.f32 %v166_v47 }
  0xb1   :  { %v455_v56 = vpop.eup %454 }
  0xb2   :  { %v175_v48 = vpop.xlane.xlu1 %174  ;;  %v172_v49 = vpop.xlane.xlu0 %171  ;;  %v216_v62 = vmin.f32 %v455_v56, 1e+08 }
  0xb3   :  { %466 = vrsqrt.f32 %v175_v48 }
  0xb4   :  { %468 = vrsqrt.f32 %v172_v49 }
  0xb5   :  { %v457_v57 = vpop.eup %456 }
  0xb6   :  { %v181_v50 = vpop.xlane.xlu1 %180  ;;  %v178_v51 = vpop.xlane.xlu0 %177  ;;  %v217_v61 = vmin.f32 %v457_v57, 1e+08 }
  0xb7   :  { %v459_v60 = vpop.eup %458  ;;  %470 = vrsqrt.f32 %v181_v50 }
  0xb8   :  { %v461_v63 = vpop.eup %460  ;;  %472 = vrsqrt.f32 %v178_v51  ;;  %v218_v13 = vmin.f32 %v459_v60, 1e+08 }
  0xb9   :  { %v463_v10 = vpop.eup %462  ;;  %v219_v12 = vmin.f32 %v461_v63, 1e+08 }
  0xba   :  { %v187_v52 = vpop.xlane.xlu1 %186  ;;  %v184_v53 = vpop.xlane.xlu0 %183  ;;  %v221_v22 = vmin.f32 %v463_v10, 1e+08 }
  0xbb   :  { %474 = vrsqrt.f32 %v187_v52  ;;  %v465_v14 = vpop.eup %464 }
  0xbc   :  { %476 = vrsqrt.f32 %v184_v53  ;;  %v220_v26 = vmin.f32 %v465_v14, 1e+08 }
  0xbd   :  { %v467_v23 = vpop.eup %466 }
  0xbe   :  { %v193_v54 = vpop.xlane.xlu1 %192  ;;  %v190_v55 = vpop.xlane.xlu0 %189  ;;  %v223_v36 = vmin.f32 %v467_v23, 1e+08 }
  0xbf   :  { %478 = vrsqrt.f32 %v193_v54  ;;  %v469_v29 = vpop.eup %468 }
  0xc0   :  { %480 = vrsqrt.f32 %v190_v55  ;;  %v222_v42 = vmin.f32 %v469_v29, 1e+08 }
  0xc1   :  { %v471_v39 = vpop.eup %470 }
  0xc2   :  { %v199_v58 = vpop.xlane.xlu1 %198  ;;  %v196_v59 = vpop.xlane.xlu0 %195  ;;  %v225_v52 = vmin.f32 %v471_v39, 1e+08 }
  0xc3   :  { %v473_v43 = vpop.eup %472 }
  0xc4   :  { %v224_v56 = vmin.f32 %v473_v43, 1e+08 }
  0xc5   :  { %v475_v48 = vpop.eup %474 }
  0xc6   :  { %v93_v0 = vpop.xlane.xlu1 %92  ;;  %v90_v1 = vpop.xlane.xlu0 %89 }
  0xc7   :  { %v233_v2 = vmul.f32 %v217_v61, %v93_v0  ;;  %v232_v9 = vmul.f32 %v216_v62, %v90_v1  ;;  %v477_v51 = vpop.eup %476  ;;  %v227_v0 = vmin.f32 %v475_v48, 1e+08 }
  0xc8   :  { %v226_v10 = vmin.f32 %v477_v51, 1e+08 }
  0xc9   :  { %v250_v11 = vmul.f32 1.442695, %v233_v2  ;;  %v248_v15 = vmul.f32 1.442695, %v232_v9  ;;  %v479_v53 = vpop.eup %478 }
  0xca   :  { %v99_v18 = vpop.xlane.xlu1 %98  ;;  %v96_v19 = vpop.xlane.xlu0 %95  ;;  %v229_v23 = vmin.f32 %v479_v53, 1e+08 }
  0xcb   :  { %v235_v20 = vmul.f32 %v219_v12, %v99_v18  ;;  %v234_v21 = vmul.f32 %v218_v13, %v96_v19  ;;  %482 = vpow2.f32 %v250_v11  ;;  %v481_v57 = vpop.eup %480 }
  0xcc   :  { %484 = vpow2.f32 %v248_v15 }
  0xcd   :  { %v254_v24 = vmul.f32 1.442695, %v235_v20  ;;  %v252_v25 = vmul.f32 1.442695, %v234_v21 }
  0xce   :  { %v105_v30 = vpop.xlane.xlu1 %104  ;;  %v102_v31 = vpop.xlane.xlu0 %101 }
  0xcf   :  { %486 = vpow2.f32 %v254_v24  ;;  %v237_v32 = vmul.f32 %v221_v22, %v105_v30  ;;  %v236_v33 = vmul.f32 %v220_v26, %v102_v31  ;;  %v228_v30 = vmin.f32 %v481_v57, 1e+08 }
  0xd0   :  { %488 = vpow2.f32 %v252_v25 }
  0xd1   :  { %490 = vrsqrt.f32 %v199_v58  ;;  %v258_v40 = vmul.f32 1.442695, %v237_v32  ;;  %v256_v41 = vmul.f32 1.442695, %v236_v33 }
  0xd2   :  { %492 = vrsqrt.f32 %v196_v59  ;;  %v111_v46 = vpop.xlane.xlu1 %110  ;;  %v108_v47 = vpop.xlane.xlu0 %107 }
  0xd3   :  { %494 = vpow2.f32 %v258_v40  ;;  %v239_v49 = vmul.f32 %v223_v36, %v111_v46  ;;  %v238_v50 = vmul.f32 %v222_v42, %v108_v47 }
  0xd4   :  { %496 = vpow2.f32 %v256_v41 }
  0xd5   :  { %v262_v54 = vmul.f32 1.442695, %v239_v49  ;;  %v260_v55 = vmul.f32 1.442695, %v238_v50  ;;  %v483_v61 = vpop.eup %482 }
  0xd6   :  { %v117_v58 = vpop.xlane.xlu1 %116  ;;  %v114_v60 = vpop.xlane.xlu0 %113  ;;  %v282_v22 = vmul.f32 %v483_v61, %v604_v6 }
  0xd7   :  { %498 = vpow2.f32 %v262_v54  ;;  %v241_v62 = vmul.f32 %v225_v52, %v117_v58  ;;  %v240_v59 = vmul.f32 %v224_v56, %v114_v60  ;;  %v485_v63 = vpop.eup %484 }
  0xd8   :  { %500 = vpow2.f32 %v260_v55  ;;  %v281_v25 = vmul.f32 %v485_v63, %v600_v4  ;;  %v298_v4 = vsel %vm30_vm0, %v282_v22, 0.0 }
  0xd9   :  { %v487_v1 = vpop.eup %486  ;;  %v266_v2 = vmul.f32 1.442695, %v241_v62  ;;  %v264_v9 = vmul.f32 1.442695, %v240_v59 }
  0xda   :  { %v489_v11 = vpop.eup %488  ;;  %v284_v12 = vmul.f32 %v487_v1, %v602_v5  ;;  %v123_v13 = vpop.xlane.xlu1 %122  ;;  %v297_v47 = vsel %vm30_vm0, %v281_v25, 0.0 }
  0xdb   :  { %v120_v14 = vpop.xlane.xlu0 %119  ;;  %v491_v15 = vpop.eup %490  ;;  %v283_v18 = vmul.f32 %v489_v11, %v598_v3  ;;  %502 = vpow2.f32 %v266_v2  ;;  %v243_v19 = vmul.f32 %v227_v0, %v123_v13  ;;  %v299_v58 = vadd.f32 %v298_v4, %v297_v47 }
  0xdc   :  { %v242_v20 = vmul.f32 %v226_v10, %v120_v14  ;;  %v493_v21 = vpop.eup %492  ;;  %504 = vpow2.f32 %v264_v9  ;;  %v307_v31 = vsel %vm30_vm0, %v284_v12, 0.0  ;;  %v231_v39 = vmin.f32 %v491_v15, 1e+08 }
  0xdd   :  { %v495_v24 = vpop.eup %494  ;;  %v270_v26 = vmul.f32 1.442695, %v243_v19  ;;  %v306_v32 = vsel %vm30_vm0, %v283_v18, 0.0  ;;  %v230_v43 = vmin.f32 %v493_v21, 1e+08  ;;  %v300_v10 = vrot.slane %v299_v58, 4 }
  0xde   :  { %v268_v29 = vmul.f32 1.442695, %v242_v20  ;;  %v497_v5 = vpop.eup %496  ;;  %v286_v3 = vmul.f32 %v495_v24, %v606_v7  ;;  %v129_v33 = vpop.xlane.xlu1 %128  ;;  %v308_v51 = vadd.f32 %v307_v31, %v306_v32 }
  0xdf   :  { %v126_v36 = vpop.xlane.xlu0 %125  ;;  %v285_v6 = vmul.f32 %v497_v5, %v608_v8  ;;  %506 = vpow2.f32 %v270_v26  ;;  %v245_v40 = vmul.f32 %v229_v23, %v129_v33 }
  0xe0   :  { %v244_v41 = vmul.f32 %v228_v30, %v126_v36  ;;  %v316_v42 = vsel %vm30_vm0, %v286_v3, 0.0  ;;  %508 = vpow2.f32 %v268_v29  ;;  %v309_v1 = vrot.slane %v308_v51, 4 }
  0xe1   :  { %v499_v46 = vpop.eup %498  ;;  %v315_v48 = vsel %vm30_vm0, %v285_v6, 0.0  ;;  %v274_v7 = vmul.f32 1.442695, %v245_v40 }
  0xe2   :  { %v272_v49 = vmul.f32 1.442695, %v244_v41  ;;  %v501_v50 = vpop.eup %500  ;;  %v317_v52 = vadd.f32 %v316_v42, %v315_v48  ;;  %v288_v8 = vmul.f32 %v499_v46, %v620_v16  ;;  %v135_v53 = vpop.xlane.xlu1 %134  ;;  %v310_v18 = vadd.f32 %v309_v1, %v308_v51 }
  0xe3   :  { %v132_v54 = vpop.xlane.xlu0 %131  ;;  %v287_v55 = vmul.f32 %v501_v50, %v622_v17  ;;  %510 = vpow2.f32 %v274_v7  ;;  %v247_v56 = vmul.f32 %v231_v39, %v135_v53 }
  0xe4   :  { %v246_v57 = vmul.f32 %v230_v43, %v132_v54  ;;  %v325_v60 = vsel %vm30_vm0, %v288_v8, 0.0  ;;  %512 = vpow2.f32 %v272_v49  ;;  %v318_v16 = vrot.slane %v317_v52, 4 }
  0xe5   :  { %v503_v61 = vpop.eup %502  ;;  %v324_v62 = vsel %vm30_vm0, %v287_v55, 0.0  ;;  %v278_v59 = vmul.f32 1.442695, %v247_v56  ;;  %v311_v29 = vrot.slane %v310_v18, 2 }
  0xe6   :  { %v276_v63 = vmul.f32 1.442695, %v246_v57  ;;  %v505_v0 = vpop.eup %504  ;;  %v326_v2 = vadd.f32 %v325_v60, %v324_v62  ;;  %v290_v9 = vmul.f32 %v503_v61, %v636_v27  ;;  %v319_v20 = vadd.f32 %v318_v16, %v317_v52 }
  0xe7   :  { %v289_v17 = vmul.f32 %v505_v0, %v638_v28  ;;  %514 = vpow2.f32 %v278_v59  ;;  %v301_v27 = vadd.f32 %v300_v10, %v299_v58  ;;  %v312_v4 = vadd.f32 %v311_v29, %v310_v18 }
  0xe8   :  { %v327_v11 = vrot.slane %v326_v2, 4  ;;  %516 = vpow2.f32 %v276_v63  ;;  %v334_v13 = vsel %vm30_vm0, %v290_v9, 0.0  ;;  %v320_v32 = vrot.slane %v319_v20, 2 }
  0xe9   :  { %v507_v12 = vpop.eup %506  ;;  %v333_v14 = vsel %vm30_vm0, %v289_v17, 0.0  ;;  %v302_v33 = vrot.slane %v301_v27, 2  ;;  %v313_v53 = vrot.slane %v312_v4, 1 }
  0xea   :  { %v509_v15 = vpop.eup %508  ;;  %v335_v19 = vadd.f32 %v334_v13, %v333_v14  ;;  %v292_v21 = vmul.f32 %v507_v12, %v646_v34  ;;  %v328_v23 = vadd.f32 %v327_v11, %v326_v2  ;;  %v321_v46 = vadd.f32 %v320_v32, %v319_v20 }
  0xeb   :  { %v291_v22 = vmul.f32 %v509_v15, %v648_v35  ;;  %v303_v7 = vadd.f32 %v302_v33, %v301_v27 }
  0xec   :  { %v336_v28 = vrot.slane %v335_v19, 4  ;;  %v343_v25 = vsel %vm30_vm0, %v292_v21, 0.0  ;;  %v329_v36 = vrot.slane %v328_v23, 2  ;;  %v322_v56 = vrot.slane %v321_v46, 1  ;;  %v280_v21 = vld [vmem:[#allocation5] sm:$0xff] }
  0xed   :  { %v511_v24 = vpop.eup %510  ;;  %v342_v26 = vsel %vm30_vm0, %v291_v22, 0.0  ;;  %v304_v58 = vrot.slane %v303_v7, 1 }
  0xee   :  { %v337_v30 = vadd.f32 %v336_v28, %v335_v19  ;;  %v344_v5 = vadd.f32 %v343_v25, %v342_v26  ;;  %v513_v31 = vpop.eup %512  ;;  %v294_v3 = vmul.f32 %v511_v24, %v650_v37  ;;  %v330_v49 = vadd.f32 %v329_v36, %v328_v23 }
  0xef   :  { %v293_v35 = vmul.f32 %v513_v31, %v652_v38  ;;  %v323_v0 = vadd.f32 %v322_v56, %v321_v46  ;;  %v305_v2 = vadd.f32 %v304_v58, %v303_v7 }
  0xf0   :  { %v345_v34 = vrot.slane %v344_v5, 4  ;;  %v338_v6 = vrot.slane %v337_v30, 2  ;;  %v352_v40 = vsel %vm30_vm0, %v294_v3, 0.0  ;;  %v331_v60 = vrot.slane %v330_v49, 1 }
  0xf1   :  { %v515_v39 = vpop.eup %514  ;;  %v351_v43 = vsel %vm30_vm0, %v293_v35, 0.0 }
  0xf2   :  { %v517_v41 = vpop.eup %516  ;;  %v346_v42 = vadd.f32 %v345_v34, %v344_v5  ;;  %v353_v47 = vadd.f32 %v352_v40, %v351_v43  ;;  %v296_v48 = vmul.f32 %v515_v39, %v660_v44  ;;  %v339_v51 = vadd.f32 %v338_v6, %v337_v30 }
  0xf3   :  { %v295_v37 = vmul.f32 %v517_v41, %v662_v45  ;;  %v314_v45 = vadd.f32 %v313_v53, %v312_v4  ;;  %v332_v16 = vadd.f32 %v331_v60, %v330_v49 }
  0xf4   :  { %v347_v50 = vrot.slane %v346_v42, 2  ;;  %v354_v38 = vrot.slane %v353_v47, 4  ;;  %v361_v52 = vsel %vm30_vm0, %v296_v48, 0.0  ;;  %v340_v44 = vrot.slane %v339_v51, 1 }
  0xf5   :  { %v360_v8 = vsel %vm30_vm0, %v295_v37, 0.0  ;;  %v378_v13 = vsel %vm377_vm1, %v314_v45, %v305_v2 }
  0xf6   :  { %v348_v54 = vadd.f32 %v347_v50, %v346_v42  ;;  %v362_v55 = vadd.f32 %v361_v52, %v360_v8  ;;  %v355_v57 = vadd.f32 %v354_v38, %v353_v47  ;;  %v341_v17 = vadd.f32 %v340_v44, %v339_v51 }
  0xf7   :  { %v380_v15 = vsel %vm379_vm2, %v323_v0, %v378_v13 }
  0xf8   :  { %v363_v61 = vrot.slane %v362_v55, 4  ;;  %v356_v62 = vrot.slane %v355_v57, 2  ;;  %v349_v63 = vrot.slane %v348_v54, 1  ;;  %v382_v19 = vsel %vm381_vm3, %v332_v16, %v380_v15 }
  0xf9   :  { %v384_v20 = vsel %vm383_vm4, %v341_v17, %v382_v19 }
  0xfa   :  { %v364_v59 = vadd.f32 %v363_v61, %v362_v55  ;;  %v357_v1 = vadd.f32 %v356_v62, %v355_v57  ;;  %v350_v11 = vadd.f32 %v349_v63, %v348_v54 }
  0xfc   :  { %v365_v9 = vrot.slane %v364_v59, 2  ;;  %v358_v10 = vrot.slane %v357_v1, 1  ;;  %v386_v27 = vsel %vm385_vm5, %v350_v11, %v384_v20 }
  0xfe   :  { %v366_v12 = vadd.f32 %v365_v9, %v364_v59  ;;  %v359_v14 = vadd.f32 %v358_v10, %v357_v1 }
 0x100   :  { %v367_v18 = vrot.slane %v366_v12, 1  ;;  %v388_v23 = vsel %vm387_vm6, %v359_v14, %v386_v27 }
 0x102   :  { %v368_v22 = vadd.f32 %v367_v18, %v366_v12 }
 0x104   :  { %v390_v28 = vsel %vm389_vm7, %v368_v22, %v388_v23 }
 0x105   :  { %v392_v24 = vadd.f32 %v390_v28, %v280_v21 }
 0x107   :  { %393 = vst.msk [vmem:[#allocation5] sm:$0xff] %vm30_vm0, %v392_v24 }
 0x108   :  { %551 = shalt.err (!%p548_p12)
}
 0x109   :  { %s552_s28 = scalar_lea.hbm %s761_s2, 128 }
 0x10a   :  { %p553_p13 = scmp.ne.s32.totalorder %s761_s2, %s552_s28  ;;  %p556_p0 = scmp.lt.u32.totalorder %s552_s28, %s761_s2 }
 0x10c   :  { %p558_p1 = pnand %p556_p0, %p553_p13 }
 0x10e   :  { %561 = shalt.err (!%p558_p1)
}
 0x10f   :  { %403 = dma.vmem_to_hbm [thread:$0]  %s401_s24, 128, %s761_s2, [#allocation4]  }
 0x110   :  { %564 = dma.done.wait [#allocation4], 128  }
 0x111   :  { %565 = vsyncadd [#allocation4], 4294967168 }
 0x112   :  { %407 = vsyncpa [#allocation3], 1 }
 0x113   :  { %408 = vsyncpa [#allocation4], 1 }

</bundles_post_ra>
